<compile_context>
chip_gen: v7x
topology: tpu7x:2x2x1
jax: 0.10.0
libtpu: 0.0.40
codegen_flags: <defaults>
</compile_context>

<pallas_src>
import jax
import jax.numpy as jnp
from jax import lax
from jax.experimental import pallas as pl
from jax.experimental.pallas import tpu as pltpu


def _residual_kernel(col_ref, w1_ref, b1_ref, w2_ref, b2_ref, o_ref):
    # col_ref : (9*Cin, TN)   im2col of padded input, rows = (tap, cin),
    #                         columns = flattened (b, h, w) (NCHW order)
    # w1_ref  : (Chid, 9*Cin) 3x3 conv weights with BN1 scale folded in
    # b1_ref  : (Chid, 1)     folded BN1 bias
    # w2_ref  : (Cout, Chid)  1x1 conv weights with BN2 scale folded in
    # b2_ref  : (Cout, 1)     folded BN2 bias
    # o_ref   : (Cout, TN)    output, flattened NCHW
    col = col_ref[...]                                    # (9*Cin, TN) f32

    # Fused 3x3 conv (+BN1 scale folded into w1): one im2col matmul.
    h = jnp.dot(w1_ref[...], col, preferred_element_type=jnp.float32)
    h = h + b1_ref[...]                                   # BN1 bias
    h = h * jax.nn.sigmoid(h)                             # SiLU (sigmoid on EUP)

    # 1x1 projection conv (+BN2 scale folded into w2) + BN2 bias.
    y = jnp.dot(w2_ref[...], h, preferred_element_type=jnp.float32)
    y = y + b2_ref[...]

    # Residual add: the center tap (kh=1, kw=1) rows of the im2col buffer are
    # exactly the original x for these columns (requires Cin == Cout).
    cin = col_ref.shape[0] // 9
    y = y + col[4 * cin:5 * cin, :]

    o_ref[...] = y.astype(o_ref.dtype)


def _pick_tn(n_total, max_tn=2048):
    """Largest lane tile (multiple of 128) dividing n_total, capped at max_tn."""
    if n_total <= max_tn:
        return n_total
    for tn in range(max_tn, 127, -128):
        if n_total % tn == 0:
            return tn
    return n_total


def residual_forward(x_nchw, params):
    """x_nchw: (B, Cin, H, W).  Returns (B, Cout, H, W), matching PyTorch."""
    w1m, s1, b1, w2m, s2, b2 = params
    B, Cin, H, W = x_nchw.shape
    Chid = w1m.shape[0]
    Cout = w2m.shape[0]
    assert Cin == Cout, "residual add path requires in_channels == out_channels"
    n_total = B * H * W

    # Fold BN scales into the conv weights (tiny tensors; done once by XLA).
    w1f = (w1m * s1).astype(jnp.float32)                  # (Chid, 9*Cin)
    w2f = (w2m * s2).astype(jnp.float32)                  # (Cout, Chid)

    # im2col in the wrapper: rows ordered (tap = kh*3+kw, cin), columns ordered
    # (b, h, w), i.e. flattened NCHW.
    xp = jnp.pad(x_nchw, ((0, 0), (0, 0), (1, 1), (1, 1)))
    taps = [xp[:, :, kh:kh + H, kw:kw + W]
            for kh in range(3) for kw in range(3)]        # each (B,Cin,H,W)
    col = jnp.stack(taps, axis=0)                         # (9,B,Cin,H,W)
    col = col.transpose(0, 2, 1, 3, 4).reshape(9 * Cin, n_total)

    tn = _pick_tn(n_total)
    grid = (n_total // tn,)

    out = pl.pallas_call(
        _residual_kernel,
        out_shape=jax.ShapeDtypeStruct((Cout, n_total), x_nchw.dtype),
        grid_spec=pltpu.PrefetchScalarGridSpec(
            num_scalar_prefetch=0,
            grid=grid,
            in_specs=[
                pl.BlockSpec((9 * Cin, tn), lambda n: (0, n)),
                pl.BlockSpec((Chid, 9 * Cin), lambda n: (0, 0)),
                pl.BlockSpec((Chid, 1), lambda n: (0, 0)),
                pl.BlockSpec((Cout, Chid), lambda n: (0, 0)),
                pl.BlockSpec((Cout, 1), lambda n: (0, 0)),
            ],
            out_specs=pl.BlockSpec((Cout, tn), lambda n: (0, n)),
        ),
        compiler_params=pltpu.CompilerParams(
            dimension_semantics=("parallel",)),
    )(col, w1f, b1, w2f, b2)

    # (Cout, B*H*W) -> (B, Cout, H, W): pure layout, tiny tensor, done by XLA.
    return out.reshape(Cout, B, H, W).transpose(1, 0, 2, 3)


def make_params(key, cin, chid, cout, eps=1e-3):
    """Deterministic synthetic parameters (conv weights + eval-mode BN stats)."""
    ks = jax.random.split(key, 10)
    # PyTorch conv weight layouts: (out, in, kh, kw)
    w1_oihw = jax.random.normal(ks[0], (chid, cin, 3, 3), jnp.float32) * 0.1
    w2_oihw = jax.random.normal(ks[1], (cout, chid, 1, 1), jnp.float32) * 0.1
    # BatchNorm2d(eps=1e-3) parameters / running stats (eval mode)
    g1 = 1.0 + 0.1 * jax.random.normal(ks[2], (chid,), jnp.float32)
    be1 = 0.1 * jax.random.normal(ks[3], (chid,), jnp.float32)
    m1 = 0.1 * jax.random.normal(ks[4], (chid,), jnp.float32)
    v1 = jnp.abs(1.0 + 0.1 * jax.random.normal(ks[5], (chid,), jnp.float32))
    g2 = 1.0 + 0.1 * jax.random.normal(ks[6], (cout,), jnp.float32)
    be2 = 0.1 * jax.random.normal(ks[7], (cout,), jnp.float32)
    m2 = 0.1 * jax.random.normal(ks[8], (cout,), jnp.float32)
    v2 = jnp.abs(1.0 + 0.1 * jax.random.normal(ks[9], (cout,), jnp.float32))

    # Fold BN: y = gamma * (x - mean) / sqrt(var + eps) + beta = x*scale + bias
    s1 = g1 / jnp.sqrt(v1 + eps)
    b1 = be1 - m1 * s1
    s2 = g2 / jnp.sqrt(v2 + eps)
    b2 = be2 - m2 * s2

    # Kernel-layout weights:
    #   w1m[o, (kh*3+kw)*Cin + ci] = w1_oihw[o, ci, kh, kw]
    w1m = jnp.transpose(w1_oihw, (0, 2, 3, 1)).reshape(chid, 9 * cin)
    w2m = w2_oihw.reshape(cout, chid)
    kernel_params = (w1m, s1.reshape(-1, 1), b1.reshape(-1, 1),
                     w2m, s2.reshape(-1, 1), b2.reshape(-1, 1))
    torch_style = (w1_oihw, w2_oihw, (g1, be1, m1, v1), (g2, be2, m2, v2))
    return kernel_params, torch_style


def reference_forward(x_nchw, torch_style, eps=1e-3):
    """Pure-JAX replica of the PyTorch forward (eval-mode BN), NCHW layout."""
    w1_oihw, w2_oihw, bn1, bn2 = torch_style
    g1, be1, m1, v1 = bn1
    g2, be2, m2, v2 = bn2
    dn = lax.conv_dimension_numbers(x_nchw.shape, w1_oihw.shape,
                                    ('NCHW', 'OIHW', 'NCHW'))
    h = lax.conv_general_dilated(x_nchw, w1_oihw, (1, 1), ((1, 1), (1, 1)),
                                 dimension_numbers=dn)
    h = (h - m1[None, :, None, None]) / jnp.sqrt(v1 + eps)[None, :, None, None]
    h = h * g1[None, :, None, None] + be1[None, :, None, None]
    h = h * jax.nn.sigmoid(h)  # SiLU
    dn2 = lax.conv_dimension_numbers(h.shape, w2_oihw.shape,
                                     ('NCHW', 'OIHW', 'NCHW'))
    y = lax.conv_general_dilated(h, w2_oihw, (1, 1), ((0, 0), (0, 0)),
                                 dimension_numbers=dn2)
    y = (y - m2[None, :, None, None]) / jnp.sqrt(v2 + eps)[None, :, None, None]
    y = y * g2[None, :, None, None] + be2[None, :, None, None]
    return x_nchw + y  # self.add is True (s == 1, in == out)


if __name__ == "__main__":
    # Residual(args(tf=False), in_channels=4, out_channels=4, s=1, r=2, fused=True)
    B, Cin, H, W = 2, 4, 16, 16
    r = 2
    Chid, Cout = r * Cin, Cin

    key = jax.random.PRNGKey(0)
    kx, kp = jax.random.split(key)
    x = jax.random.normal(kx, (B, Cin, H, W), jnp.float32)
    kernel_params, torch_style = make_params(kp, Cin, Chid, Cout)

    out = jax.block_until_ready(residual_forward(x, kernel_params))
    ref = jax.block_until_ready(reference_forward(x, torch_style))

    assert out.shape == (B, Cout, H, W)
    assert jnp.allclose(out, ref, atol=1e-4, rtol=1e-4), \
        f"max abs err {jnp.max(jnp.abs(out - ref))}"
    print("KERNEL_OK")
</pallas_src>

<mosaic_0001>
module attributes {stable_mosaic.version = 11 : i64} {
  func.func @_residual_kernel(%arg0: i32, %arg1: memref<36x512xf32, #tpu.memory_space<vmem>>, %arg2: memref<8x36xf32, #tpu.memory_space<vmem>>, %arg3: memref<8x1xf32, #tpu.memory_space<vmem>>, %arg4: memref<4x8xf32, #tpu.memory_space<vmem>>, %arg5: memref<4x1xf32, #tpu.memory_space<vmem>>, %arg6: memref<4x512xf32, #tpu.memory_space<vmem>>) attributes {dimension_semantics = [#tpu.dimension_semantics<parallel>], iteration_bounds = array<i64: 1>, scalar_prefetch = 0 : i64, scratch_operands = 0 : i64, tpu.core_type = #tpu.core_type<tc>, window_params = [{transform_indices = @transform_0, window_bounds = array<i64: 36, 512>}, {pipeline_mode = #tpu.pipeline_mode<synchronous>, transform_indices = @transform_1, window_bounds = array<i64: 8, 36>}, {pipeline_mode = #tpu.pipeline_mode<synchronous>, transform_indices = @transform_2, window_bounds = array<i64: 8, 1>}, {pipeline_mode = #tpu.pipeline_mode<synchronous>, transform_indices = @transform_3, window_bounds = array<i64: 4, 8>}, {pipeline_mode = #tpu.pipeline_mode<synchronous>, transform_indices = @transform_4, window_bounds = array<i64: 4, 1>}, {transform_indices = @transform_5, window_bounds = array<i64: 4, 512>}]} {
    %c0 = arith.constant 0 : index
    %c0_0 = arith.constant 0 : index
    %0 = vector.load %arg1[%c0, %c0_0] : memref<36x512xf32, #tpu.memory_space<vmem>>, vector<36x512xf32>
    %c0_1 = arith.constant 0 : index
    %c0_2 = arith.constant 0 : index
    %1 = vector.load %arg2[%c0_1, %c0_2] : memref<8x36xf32, #tpu.memory_space<vmem>>, vector<8x36xf32>
    %cst = arith.constant dense<0.000000e+00> : vector<8x512xf32>
    %2 = tpu.matmul %1, %0, %cst {dimension_numbers = #tpu.dot_dimension_numbers<[1], [0], [0], [1], [0, 0, 1, 1], [], []>} : vector<8x36xf32>, vector<36x512xf32>, vector<8x512xf32> -> vector<8x512xf32>
    %c0_3 = arith.constant 0 : index
    %c0_4 = arith.constant 0 : index
    %3 = vector.load %arg3[%c0_3, %c0_4] : memref<8x1xf32, #tpu.memory_space<vmem>>, vector<8x1xf32>
    %4 = vector.broadcast %3 : vector<8x1xf32> to vector<8x512xf32>
    %5 = arith.addf %2, %4 : vector<8x512xf32>
    %6 = arith.negf %5 : vector<8x512xf32>
    %7 = math.exp %6 : vector<8x512xf32>
    %cst_5 = arith.constant 1.000000e+00 : f32
    %8 = vector.broadcast %cst_5 : f32 to vector<8x512xf32>
    %9 = arith.addf %8, %7 : vector<8x512xf32>
    %10 = arith.divf %8, %9 : vector<8x512xf32>
    %11 = arith.mulf %5, %10 : vector<8x512xf32>
    %c0_6 = arith.constant 0 : index
    %c0_7 = arith.constant 0 : index
    %12 = vector.load %arg4[%c0_6, %c0_7] : memref<4x8xf32, #tpu.memory_space<vmem>>, vector<4x8xf32>
    %cst_8 = arith.constant dense<0.000000e+00> : vector<4x512xf32>
    %13 = tpu.matmul %12, %11, %cst_8 {dimension_numbers = #tpu.dot_dimension_numbers<[1], [0], [0], [1], [0, 0, 1, 1], [], []>} : vector<4x8xf32>, vector<8x512xf32>, vector<4x512xf32> -> vector<4x512xf32>
    %c0_9 = arith.constant 0 : index
    %c0_10 = arith.constant 0 : index
    %14 = vector.load %arg5[%c0_9, %c0_10] : memref<4x1xf32, #tpu.memory_space<vmem>>, vector<4x1xf32>
    %15 = vector.broadcast %14 : vector<4x1xf32> to vector<4x512xf32>
    %16 = arith.addf %13, %15 : vector<4x512xf32>
    %17 = vector.extract_strided_slice %0 {offsets = [16, 0], sizes = [4, 512], strides = [1, 1]} : vector<36x512xf32> to vector<4x512xf32>
    %18 = arith.addf %16, %17 : vector<4x512xf32>
    %c0_11 = arith.constant 0 : index
    %c0_12 = arith.constant 0 : index
    %19 = vector.load %arg6[%c0_11, %c0_12] : memref<4x512xf32, #tpu.memory_space<vmem>>, vector<4x512xf32>
    tpu.vector_store %arg6[%c0_11, %c0_12], %18 {strides = array<i32>} : memref<4x512xf32, #tpu.memory_space<vmem>>, vector<4x512xf32>,
    return
  }
  func.func @transform_0(%arg0: i32) -> (i32, i32) {
    %c0_i32 = arith.constant 0 : i32
    %c0_i32_0 = arith.constant 0 : i32
    return %c0_i32, %arg0 : i32, i32
  }
  func.func @transform_1(%arg0: i32) -> (i32, i32) {
    %c0_i32 = arith.constant 0 : i32
    %c0_i32_0 = arith.constant 0 : i32
    %c0_i32_1 = arith.constant 0 : i32
    return %c0_i32, %c0_i32_0 : i32, i32
  }
  func.func @transform_2(%arg0: i32) -> (i32, i32) {
    %c0_i32 = arith.constant 0 : i32
    %c0_i32_0 = arith.constant 0 : i32
    %c0_i32_1 = arith.constant 0 : i32
    return %c0_i32, %c0_i32_0 : i32, i32
  }
  func.func @transform_3(%arg0: i32) -> (i32, i32) {
    %c0_i32 = arith.constant 0 : i32
    %c0_i32_0 = arith.constant 0 : i32
    %c0_i32_1 = arith.constant 0 : i32
    return %c0_i32, %c0_i32_0 : i32, i32
  }
  func.func @transform_4(%arg0: i32) -> (i32, i32) {
    %c0_i32 = arith.constant 0 : i32
    %c0_i32_0 = arith.constant 0 : i32
    %c0_i32_1 = arith.constant 0 : i32
    return %c0_i32, %c0_i32_0 : i32, i32
  }
  func.func @transform_5(%arg0: i32) -> (i32, i32) {
    %c0_i32 = arith.constant 0 : i32
    %c0_i32_0 = arith.constant 0 : i32
    return %c0_i32, %arg0 : i32, i32
  }
}

</mosaic_0001>

<bundles_post_ra>
// kernel: tpu_custom_call.1
= control target key start
LH: loop header
LB: loop body
LE: loop exit
PB: predicated region body
PF: predicated region fallthrough
CT: control target
= control target key end

     0   :  { %10 = vsyncpa [#allocation3], 0  ;;  %s618_s0 = inlined_call_operand.hbm [shape: f32[36,512], index: 0, kind: input, shape index: {}]   ;;  %s619_s1 = inlined_call_operand.vmem [shape: f32[8,36], index: 1, kind: input, shape index: {}]   ;;  %s620_s2 = inlined_call_operand.vmem [shape: f32[8,1], index: 2, kind: input, shape index: {}]   ;;  %s621_s3 = inlined_call_operand.vmem [shape: f32[4,8], index: 3, kind: input, shape index: {}]   ;;  %s622_s4 = inlined_call_operand.vmem [shape: f32[4,1], index: 4, kind: input, shape index: {}]   ;;  %s623_s5 = inlined_call_operand.hbm [shape: f32[4,512], index: 5, kind: output, shape index: {}]  }
   0x1   :  { %11 = vsyncpa [#allocation4], 0  ;;  %s530_s18 = smov [#allocation2]   ;;  %s482_s22 = scalar_lea.hbm %s618_s0, 2560 }
   0x2   :  { %s17_s19 = sshll.u32 %s530_s18, 4  ;;  %p483_p0 = scmp.ne.s32.totalorder %s618_s0, %s482_s22  ;;  %s18_s19 = int_to_ptr.vmem [resolvable:$true] %s17_s19 }
   0x3   :  { %p486_p1 = scmp.lt.u32.totalorder %s482_s22, %s618_s0 }
   0x5   :  { %p488_p2 = pnand %p486_p1, %p483_p0 }
   0x7   :  { %491 = shalt.err (!%p488_p2)
}
   0x8   :  { %s492_s27 = scalar_lea.vmem %s18_s19, 2560  ;;  %p497_p4 = scmp.lt.s32.totalorder %s18_s19, %s18_s19 }
   0x9   :  { %p493_p3 = scmp.ne.s32.totalorder %s18_s19, %s492_s27  ;;  %p498_p5 = scmp.lt.s32.totalorder %s492_s27, %s492_s27 }
   0xb   :  { %p499_p6 = por %p498_p5, %p497_p4 }
   0xd   :  { %p500_p7 = pnand %p499_p6, %p493_p3 }
   0xf   :  { %503 = shalt.err (!%p500_p7)
}
  0x10   :  { %s531_s28 = smov 512   ;;  %s532_s29 = smov 32  }
  0x11   :  { %23 = dma.hbm_to_vmem [thread:$0]  %s618_s0, 2560, %s18_s19, [#allocation3], %s531_s28, %s531_s28, %s532_s29  }
  0x12   :  { %526 = dma.done.wait [#allocation3], 2560  }
  0x13   :  { %527 = vsyncadd [#allocation3], 4294964736  ;;  %v533_v0 = vmov 0.0   ;;  %v534_v1 = vmov 0   ;;  %v36_v2 = vld [vmem:[#allocation2 + $0x8] sm:$0xff]  ;;  %v38_v4 = vld [vmem:[#allocation2 + $0x18] sm:$0xff] }
  0x14   :  { %143 = vmatprep.mubr.f32.mxu0 %v533_v0  ;;  %214 = vmatprep.mubr.f32.mxu1 %v533_v0  ;;  %v40_v3 = vld [vmem:[#allocation2 + $0x28] sm:$0xff]  ;;  %v42_v6 = vld [vmem:[#allocation2 + $0x38] sm:$0xff]  ;;  %v35_v7 = vld [vmem:[#allocation2] sm:$0xff]  ;;  %vm66_vm0 = vcmask 1043456   ;;  %vm62_vm1 = vcmask 293888   ;;  %vm256_vm2 = vcmask 64512  }
  0x15   :  { %465 = vset.pattern.permute.xlu0 %v534_v1  ;;  %v443_v5 = vpack.c.bf16 %v40_v3, %v36_v2  ;;  %v39_v8 = vld [vmem:[#allocation2 + $0x20] sm:$0xff]  ;;  %v451_v9 = vpack.c.bf16 %v42_v6, %v38_v4  ;;  %v37_v11 = vld [vmem:[#allocation2 + $0x10] sm:$0xff]  ;;  %v578_v13 = vld [vmem:[#allocation2 + $0x48] sm:$0xff] }
  0x16   :  { %v445_v10 = vpack.c.bf16 %v39_v8, %v35_v7  ;;  %v41_v12 = vld [vmem:[#allocation2 + $0x30] sm:$0xff]  ;;  %v48_v15 = vld [vmem:[#allocation2 + $0x68] sm:$0xff]  ;;  %v580_v16 = vld [vmem:[#allocation2 + $0x58] sm:$0xff] }
  0x17   :  { %444 = vmatprep.subr.bf16.mxu0 %v443_v5  ;;  %v453_v14 = vpack.c.bf16 %v41_v12, %v37_v11  ;;  %v50_v17 = vld [vmem:[#allocation2 + $0x78] sm:$0xff]  ;;  %452 = vmatprep.subr.bf16.mxu1 %v451_v9  ;;  %v447_v18 = vpack.c.bf16 %v48_v15, %v578_v13  ;;  %v584_v20 = vld [vmem:[#allocation2 + $0x40] sm:$0xff]  ;;  %v586_v22 = vld [vmem:[#allocation2 + $0x50] sm:$0xff] }
  0x18   :  { %446 = vmatpush1.bf16.msra.mxu0 %v445_v10  ;;  %v455_v19 = vpack.c.bf16 %v50_v17, %v580_v16  ;;  %v47_v21 = vld [vmem:[#allocation2 + $0x60] sm:$0xff]  ;;  %v49_v24 = vld [vmem:[#allocation2 + $0x70] sm:$0xff]  ;;  %v52_v26 = vld [vmem:[#allocation2 + $0x88] sm:$0xf] }
  0x19   :  { %454 = vmatpush1.bf16.msra.mxu1 %v453_v14  ;;  %v449_v23 = vpack.c.bf16 %v47_v21, %v584_v20  ;;  %448 = vmatprep.subr.bf16.mxu0 %v447_v18  ;;  %v457_v25 = vpack.c.bf16 %v49_v24, %v586_v22  ;;  %v54_v27 = vld [vmem:[#allocation2 + $0x98] sm:$0xf]  ;;  %v56_v28 = vld [vmem:[%s620_s2] sm:$0xff]  ;;  %v53_v31 = vld [vmem:[#allocation2 + $0x90] sm:$0xf] }
  0x1a   :  { %456 = vmatprep.subr.bf16.mxu1 %v455_v19  ;;  %59 = vperm.xlu0 %465, %v56_v28   ;;  %v51_v29 = vld [vmem:[#allocation2 + $0x80] sm:$0xf] }
  0x1b   :  { %v250_v30 = vld [vmem:[%s622_s4] sm:$0xf] }
  0x1c   :  { %450 = vmatpush1.bf16.msra.mxu0 %v449_v23  ;;  %v55_v32 = vld [vmem:[%s619_s1] sm:$0xff] }
  0x1d   :  { %458 = vmatpush1.bf16.msra.mxu1 %v457_v25  ;;  %431 = vmatprep.subr.msk.mxu0 %vm66_vm0, %v52_v26  ;;  %v249_v61 = vld [vmem:[%s621_s3] sm:$0xf]  ;;  %s535_s3 = smov [#allocation5]  }
  0x1e   :  { %434 = vmatprep.subr.msk.mxu1 %vm66_vm0, %v54_v27  ;;  %253 = vperm.xlu0 %465, %v250_v30   ;;  %s422_s4 = sshll.u32 %s535_s3, 4  ;;  %s423_s4 = int_to_ptr.vmem [resolvable:$true] %s422_s4 }
  0x1f   :  { %s504_s12 = scalar_lea.vmem %s423_s4, 256  ;;  %p509_p9 = scmp.lt.s32.totalorder %s423_s4, %s423_s4 }
  0x20   :  { %432 = vmatpush1.msk.msra.mxu0 %vm66_vm0, %v51_v29  ;;  %p505_p8 = scmp.ne.s32.totalorder %s423_s4, %s504_s12  ;;  %p510_p10 = scmp.lt.s32.totalorder %s504_s12, %s504_s12 }
  0x21   :  { %435 = vmatpush1.msk.msra.mxu1 %vm66_vm0, %v53_v31  ;;  %433 = vmatmul.mubr.msk.f32.vlgmr.msra.gmra.mrb[0].mxu0 %vm62_vm1, %v55_v32 }
  0x22   :  { %436 = vmatmul.mubr.msk.f32.vlgmr.msra.gmra.mrb[0].mxu1 %vm62_vm1, %v55_v32  ;;  %324 = vmatprep.mubr.f32.mxu0 %v533_v0  ;;  %p511_p11 = por %p510_p10, %p509_p9 }
  0x23   :  { %395 = vmatprep.mubr.f32.mxu1 %v533_v0 }
  0x24   :  { %p512_p12 = pnand %p511_p11, %p505_p8 }
  0x99   :  { %v60_v33 = vpop.permute.xlu0 %59 }
  0x9d   :  { %v254_v63 = vpop.permute.xlu0 %253 }
  0xf4   :  { %v145_v34 = vpop.f32.mrb[0].mxu0 }
  0xf5   :  { %v146_v35 = vadd.f32 %v145_v34, %v60_v33  ;;  %v216_v36 = vpop.f32.mrb[0].mxu1  ;;  %v147_v37 = vpop.f32.mrb[1].mxu0 }
  0xf6   :  { %v217_v38 = vadd.f32 %v216_v36, %v60_v33  ;;  %v148_v39 = vadd.f32 %v147_v37, %v60_v33  ;;  %v218_v40 = vpop.f32.mrb[1].mxu1 }
  0xf7   :  { %v437_v41 = vmul.f32 -1.442695, %v146_v35  ;;  %v219_v42 = vadd.f32 %v218_v40, %v60_v33 }
  0xf8   :  { %v439_v43 = vmul.f32 -1.442695, %v217_v38  ;;  %v438_v44 = vmul.f32 -1.442695, %v148_v39 }
  0xf9   :  { %466 = vpow2.f32 %v437_v41  ;;  %v440_v45 = vmul.f32 -1.442695, %v219_v42 }
  0xfa   :  { %468 = vpow2.f32 %v439_v43 }
  0xfb   :  { %470 = vpow2.f32 %v438_v44 }
  0xfc   :  { %472 = vpow2.f32 %v440_v45 }
 0x103   :  { %v467_v46 = vpop.eup %466 }
 0x104   :  { %v469_v47 = vpop.eup %468  ;;  %v233_v48 = vadd.f32 1.0, %v467_v46 }
 0x105   :  { %v471_v49 = vpop.eup %470  ;;  %v235_v50 = vadd.f32 1.0, %v469_v47 }
 0x106   :  { %v473_v51 = vpop.eup %472  ;;  %474 = vrcp.f32 %v233_v48  ;;  %v234_v52 = vadd.f32 1.0, %v471_v49 }
 0x107   :  { %476 = vrcp.f32 %v235_v50  ;;  %v236_v53 = vadd.f32 1.0, %v473_v51 }
 0x108   :  { %478 = vrcp.f32 %v234_v52 }
 0x109   :  { %480 = vrcp.f32 %v236_v53 }
 0x110   :  { %v475_v54 = vpop.eup %474 }
 0x111   :  { %v477_v55 = vpop.eup %476  ;;  %v245_v59 = vmul.f32 %v475_v54, %v146_v35 }
 0x112   :  { %v479_v56 = vpop.eup %478  ;;  %v247_v62 = vmul.f32 %v477_v55, %v217_v38 }
 0x113   :  { %v481_v57 = vpop.eup %480  ;;  %v246_v58 = vmul.f32 %v479_v56, %v148_v39 }
 0x114   :  { %v248_v60 = vmul.f32 %v481_v57, %v219_v42 }
 0x115   :  { %260 = vmatprep.subr.mxu0 %v246_v58 }
 0x116   :  { %331 = vmatprep.subr.mxu1 %v248_v60  ;;  %261 = vmatpush1.msra.mxu0 %v245_v59 }
 0x117   :  { %332 = vmatpush1.msra.mxu1 %v247_v62  ;;  %441 = vmatmul.mubr.msk.f32.vlgmr.msra.gmra.mrb[2].mxu0 %vm256_vm2, %v249_v61 }
 0x118   :  { %442 = vmatmul.mubr.msk.f32.vlgmr.msra.gmra.mrb[2].mxu1 %vm256_vm2, %v249_v61 }
 0x1ea   :  { %v326_v0 = vpop.f32.mrb[2].mxu0 }
 0x1eb   :  { %v327_v1 = vadd.f32 %v326_v0, %v254_v63  ;;  %v397_v2 = vpop.f32.mrb[2].mxu1  ;;  %v328_v3 = vpop.f32.mrb[3].mxu0 }
 0x1ec   :  { %v398_v4 = vadd.f32 %v397_v2, %v254_v63  ;;  %v329_v5 = vadd.f32 %v328_v3, %v254_v63  ;;  %v399_v6 = vpop.f32.mrb[3].mxu1 }
 0x1ed   :  { %v402_v7 = vadd.f32 %v327_v1, %v584_v20  ;;  %v400_v8 = vadd.f32 %v399_v6, %v254_v63 }
 0x1ee   :  { %v404_v9 = vadd.f32 %v398_v4, %v586_v22  ;;  %v403_v10 = vadd.f32 %v329_v5, %v578_v13 }
 0x1ef   :  { %v405_v11 = vadd.f32 %v400_v8, %v580_v16 }
 0x1f0   :  { %v410_v12 = vcombine.low %v402_v7, %v403_v10 }
 0x1f1   :  { %v411_v14 = vcombine.low %v404_v9, %v405_v11 }
 0x1f2   :  { %414 = vst [vmem:[#allocation5] sm:$0xff] %v410_v12 }
 0x1f3   :  { %415 = vst [vmem:[#allocation5 + $0x8] sm:$0xff] %v411_v14 }
 0x1f4   :  { %515 = shalt.err (!%p512_p12)
}
 0x1f5   :  { %s516_s15 = scalar_lea.hbm %s623_s5, 256 }
 0x1f6   :  { %p517_p13 = scmp.ne.s32.totalorder %s623_s5, %s516_s15  ;;  %p520_p0 = scmp.lt.u32.totalorder %s516_s15, %s623_s5 }
 0x1f8   :  { %p522_p1 = pnand %p520_p0, %p517_p13 }
 0x1fa   :  { %525 = shalt.err (!%p522_p1)
}
 0x1fb   :  { %425 = dma.vmem_to_hbm [thread:$0]  %s423_s4, 256, %s623_s5, [#allocation4]  }
 0x1fc   :  { %528 = dma.done.wait [#allocation4], 256  }
 0x1fd   :  { %529 = vsyncadd [#allocation4], 4294967040 }
 0x1fe   :  { %429 = vsyncpa [#allocation3], 1 }
 0x1ff   :  { %430 = vsyncpa [#allocation4], 1 }

</bundles_post_ra>
